<compile_context>
chip_gen: v6e
topology: v6e:2x2x1
jax: 0.10.0
libtpu: 0.0.40
codegen_flags: <defaults>
</compile_context>

<pallas_src>
import functools

import jax
import jax.numpy as jnp
from jax.experimental import pallas as pl
from jax.experimental.pallas import tpu as pltpu

LANE = 128


def _cdiv(a: int, b: int) -> int:
    return -(-a // b)


def _round_up(x: int, m: int) -> int:
    return _cdiv(x, m) * m


def linreg_kernel(b_ref, x_ref, w_ref, o_ref, acc_ref, *, valid_d: int, tk: int):
    # b_ref:   (1,)        f32 SMEM    bias scalar
    # x_ref:   (tb, tk)    input tile (tail blocks only partially filled -> masked below)
    # w_ref:   (1, d_pad)  full weight row, VMEM-resident (constant block, loaded once)
    # o_ref:   (1, tb)     lane-dense output tile
    # acc_ref: (tb, LANE)  f32 per-lane-group partial sums (persist across the K axis)
    k = pl.program_id(1)

    @pl.when(k == 0)
    def _init():
        acc_ref[...] = jnp.zeros_like(acc_ref)

    x = x_ref[...].astype(jnp.float32)                                          # (tb, tk)
    w = w_ref[:, pl.ds(pl.multiple_of(k * tk, LANE), tk)].astype(jnp.float32)   # (1, tk)

    if valid_d % tk != 0:
        # Ragged K tail: columns >= valid_d of the last tile hold unspecified VMEM
        # (stale data may be NaN/Inf, and NaN * 0-weight is still NaN) -> mask x.
        col = jax.lax.broadcasted_iota(jnp.int32, x.shape, 1) + k * tk
        x = jnp.where(col < valid_d, x, 0.0)

    prod = x * w                                                                # VPU

    # Lane-group partial sums: pure VPU adds in the hot loop (no per-step XLU work).
    s = prod[:, 0:LANE]
    for g in range(1, tk // LANE):
        s = s + prod[:, g * LANE:(g + 1) * LANE]
    acc_ref[...] += s

    @pl.when(k == pl.num_programs(1) - 1)
    def _finalize():
        row = jnp.sum(acc_ref[...], axis=-1)                        # (tb,) one XLU reduce
        o_ref[...] = (row[None, :] + b_ref[0]).astype(o_ref.dtype)  # one relayout per tile


@jax.jit
def linear_regression(x, weight, bias):
    """x: (B, D); weight: (1, D) (PyTorch nn.Linear layout); bias: (1,). Returns (B, 1)."""
    B, D = x.shape
    out_dtype = x.dtype

    # Generation-aware VMEM budget (v5e/v6e: 128 MiB physical; v7x: 64 MiB).
    try:
        vmem_cap = int(pltpu.get_tpu_info().vmem_capacity_bytes)
    except Exception:
        vmem_cap = 64 * 1024 * 1024          # conservative (v7x-sized) fallback
    big_vmem = vmem_cap >= 100 * 1024 * 1024

    # --- K (reduction) tile: large & lane-dense; never degrades for awkward D ---
    tk = min(2048, _round_up(D, LANE))
    num_k = _cdiv(D, tk)
    d_pad = num_k * tk                       # only the tiny weight row is padded to this

    # --- batch tile: x itself is NOT padded; tail blocks are clipped by Pallas ---
    tb_cap = 1024 if big_vmem else 512
    if B < 256:
        tb = B                               # single tile (block == full batch dim)
    else:
        tb = min(tb_cap, LANE * max(1, (B // 2) // LANE))  # >=2 tiles -> both v7x TCs busy
    num_b = _cdiv(B, tb)

    grid = (num_b, num_k)                    # reduction axis last

    # Depth-3 buffering of the streamed x tiles once the grid is long enough to pipeline.
    if num_b * num_k >= 3:
        x_spec = pl.BlockSpec((tb, tk), lambda i, k: (i, k), pipeline_mode=pl.Buffered(3))
    else:
        x_spec = pl.BlockSpec((tb, tk), lambda i, k: (i, k))

    w_p = jnp.pad(weight.astype(jnp.float32), ((0, 0), (0, d_pad - D)))   # (1, d_pad), tiny
    b_p = bias.reshape((1,)).astype(jnp.float32)

    out = pl.pallas_call(
        functools.partial(linreg_kernel, valid_d=D, tk=tk),
        out_shape=jax.ShapeDtypeStruct((1, B), out_dtype),
        grid_spec=pltpu.PrefetchScalarGridSpec(
            num_scalar_prefetch=0,
            grid=grid,
            in_specs=[
                pl.BlockSpec(memory_space=pltpu.MemorySpace.SMEM),        # bias scalar
                x_spec,                                                   # x tiles (streamed)
                pl.BlockSpec((1, d_pad), lambda i, k: (0, 0)),            # weight, resident
            ],
            out_specs=pl.BlockSpec((1, tb), lambda i, k: (0, i)),         # lane-dense output
            scratch_shapes=[pltpu.VMEM((tb, LANE), jnp.float32)],         # partial-sum acc
        ),
        compiler_params=pltpu.CompilerParams(
            dimension_semantics=("parallel", "arbitrary"),
            vmem_limit_bytes=(96 if big_vmem else 48) * 1024 * 1024,
        ),
        cost_estimate=pl.CostEstimate(
            flops=2 * B * D,
            transcendentals=0,
            bytes_accessed=4 * (B * D + d_pad + B + 1),
        ),
    )(b_p, x, w_p)

    return out.reshape(B, 1)


if __name__ == "__main__":
    key = jax.random.PRNGKey(0)
    kx, kw, kb = jax.random.split(key, 3)

    # Small shapes consistent with the module: nn.Linear(input_size=96, 1), batch=16.
    batch, input_size = 16, 96
    x = jax.random.normal(kx, (batch, input_size), dtype=jnp.float32)
    bound = 1.0 / (input_size ** 0.5)
    weight = jax.random.uniform(kw, (1, input_size), jnp.float32, -bound, bound)
    bias = jax.random.uniform(kb, (1,), jnp.float32, -bound, bound)

    out = linear_regression(x, weight, bias)
    jax.block_until_ready(out)

    ref = jnp.sum(x * weight, axis=-1, keepdims=True) + bias
    assert out.shape == (batch, 1), out.shape
    assert jnp.allclose(out, ref, atol=1e-5, rtol=1e-5), float(jnp.max(jnp.abs(out - ref)))

    # Second check at a modest ragged size to exercise the multi-batch-tile, K-tail-mask
    # and depth-3 buffered paths (B=300 -> 3 tiles of 128; D=2500 -> 2 K steps, 452 tail).
    kx2, kw2, kb2 = jax.random.split(jax.random.PRNGKey(1), 3)
    batch2, input2 = 300, 2500
    x2 = jax.random.normal(kx2, (batch2, input2), dtype=jnp.float32)
    bound2 = 1.0 / (input2 ** 0.5)
    w2 = jax.random.uniform(kw2, (1, input2), jnp.float32, -bound2, bound2)
    b2 = jax.random.uniform(kb2, (1,), jnp.float32, -bound2, bound2)

    out2 = linear_regression(x2, w2, b2)
    jax.block_until_ready(out2)

    ref2 = jnp.sum(x2 * w2, axis=-1, keepdims=True) + b2
    assert out2.shape == (batch2, 1), out2.shape
    assert jnp.allclose(out2, ref2, atol=1e-4, rtol=1e-4), float(jnp.max(jnp.abs(out2 - ref2)))

    print("KERNEL_OK")
</pallas_src>

<mosaic_0001>
module attributes {stable_mosaic.version = 11 : i64} {
  func.func @linreg_kernel(%arg0: i32, %arg1: i32, %arg2: memref<1xf32, #tpu.memory_space<smem>>, %arg3: memref<16x128xf32, #tpu.memory_space<vmem>>, %arg4: memref<1x128xf32, #tpu.memory_space<vmem>>, %arg5: memref<1x16xf32, #tpu.memory_space<vmem>>, %arg6: memref<16x128xf32, #tpu.memory_space<vmem>>) attributes {dimension_semantics = [#tpu.dimension_semantics<parallel>, #tpu.dimension_semantics<arbitrary>], iteration_bounds = array<i64: 1, 1>, scalar_prefetch = 0 : i64, scratch_operands = 1 : i64, tpu.core_type = #tpu.core_type<tc>, window_params = [{transform_indices = @transform_0, window_bounds = array<i64: 1>}, {transform_indices = @transform_1, window_bounds = array<i64: 16, 128>}, {pipeline_mode = #tpu.pipeline_mode<synchronous>, transform_indices = @transform_2, window_bounds = array<i64: 1, 128>}, {transform_indices = @transform_3, window_bounds = array<i64: 1, 16>}]} {
    %c0_i32 = arith.constant 0 : i32
    %0 = arith.cmpi eq, %arg1, %c0_i32 : i32
    %1 = arith.extui %0 : i1 to i32
    %c0_i32_0 = arith.constant 0 : i32
    %2 = arith.cmpi ne, %1, %c0_i32_0 : i32
    scf.if %2 {
      %cst_10 = arith.constant 0.000000e+00 : f32
      %24 = vector.broadcast %cst_10 : f32 to vector<16x128xf32>
      %c0_11 = arith.constant 0 : index
      %c0_12 = arith.constant 0 : index
      %25 = vector.load %arg6[%c0_11, %c0_12] : memref<16x128xf32, #tpu.memory_space<vmem>>, vector<16x128xf32>
      tpu.vector_store %arg6[%c0_11, %c0_12], %24 {strides = array<i32>} : memref<16x128xf32, #tpu.memory_space<vmem>>, vector<16x128xf32>,
    } else {
    }
    %c0 = arith.constant 0 : index
    %c0_1 = arith.constant 0 : index
    %3 = vector.load %arg3[%c0, %c0_1] : memref<16x128xf32, #tpu.memory_space<vmem>>, vector<16x128xf32>
    %c128_i32 = arith.constant 128 : i32
    %4 = arith.muli %arg1, %c128_i32 : i32
    %5 = tpu.assume_multiple %4, 128 : i32
    %c0_2 = arith.constant 0 : index
    %6 = arith.index_cast %5 : i32 to index
    %7 = vector.load %arg4[%c0_2, %6] : memref<1x128xf32, #tpu.memory_space<vmem>>, vector<1x128xf32>
    %8 = tpu.iota {dimensions = array<i32: 1>} : vector<16x128xi32>
    %c128_i32_3 = arith.constant 128 : i32
    %9 = arith.muli %arg1, %c128_i32_3 : i32
    %10 = vector.broadcast %9 : i32 to vector<16x128xi32>
    %11 = arith.addi %8, %10 : vector<16x128xi32>
    %c96_i32 = arith.constant 96 : i32
    %12 = vector.broadcast %c96_i32 : i32 to vector<16x128xi32>
    %13 = arith.cmpi slt, %11, %12 : vector<16x128xi32>
    %cst = arith.constant 0.000000e+00 : f32
    %14 = vector.broadcast %cst : f32 to vector<16x128xf32>
    %15 = arith.select %13, %3, %14 : vector<16x128xi1>, vector<16x128xf32>
    %16 = vector.broadcast %7 : vector<1x128xf32> to vector<16x128xf32>
    %17 = arith.mulf %15, %16 : vector<16x128xf32>
    %c0_4 = arith.constant 0 : index
    %c0_5 = arith.constant 0 : index
    %18 = vector.load %arg6[%c0_4, %c0_5] : memref<16x128xf32, #tpu.memory_space<vmem>>, vector<16x128xf32>
    %19 = arith.addf %18, %17 : vector<16x128xf32>
    %c0_6 = arith.constant 0 : index
    %c0_7 = arith.constant 0 : index
    %20 = vector.load %arg6[%c0_6, %c0_7] : memref<16x128xf32, #tpu.memory_space<vmem>>, vector<16x128xf32>
    tpu.vector_store %arg6[%c0_6, %c0_7], %19 {strides = array<i32>} : memref<16x128xf32, #tpu.memory_space<vmem>>, vector<16x128xf32>,
    %c0_i32_8 = arith.constant 0 : i32
    %21 = arith.cmpi eq, %arg1, %c0_i32_8 : i32
    %22 = arith.extui %21 : i1 to i32
    %c0_i32_9 = arith.constant 0 : i32
    %23 = arith.cmpi ne, %22, %c0_i32_9 : i32
    scf.if %23 {
      %c0_10 = arith.constant 0 : index
      %c0_11 = arith.constant 0 : index
      %24 = vector.load %arg6[%c0_10, %c0_11] : memref<16x128xf32, #tpu.memory_space<vmem>>, vector<16x128xf32>
      %cst_12 = arith.constant dense<0.000000e+00> : vector<16xf32>
      %25 = vector.multi_reduction <add>, %24, %cst_12 [1] : vector<16x128xf32> to vector<16xf32>
      %26 = vector.shape_cast %25 : vector<16xf32> to vector<1x16xf32>
      %c0_13 = arith.constant 0 : index
      %27 = memref.load %arg2[%c0_13] : memref<1xf32, #tpu.memory_space<smem>>
      %28 = vector.broadcast %27 : f32 to vector<1x16xf32>
      %29 = arith.addf %26, %28 : vector<1x16xf32>
      %c0_14 = arith.constant 0 : index
      %c0_15 = arith.constant 0 : index
      %30 = vector.load %arg5[%c0_14, %c0_15] : memref<1x16xf32, #tpu.memory_space<vmem>>, vector<1x16xf32>
      tpu.vector_store %arg5[%c0_14, %c0_15], %29 {strides = array<i32>} : memref<1x16xf32, #tpu.memory_space<vmem>>, vector<1x16xf32>,
    } else {
    }
    return
  }
  func.func @transform_0(%arg0: i32, %arg1: i32) -> i32 {
    %c0_i32 = arith.constant 0 : i32
    %c0_i32_0 = arith.constant 0 : i32
    return %c0_i32 : i32
  }
  func.func @transform_1(%arg0: i32, %arg1: i32) -> (i32, i32) {
    %c0_i32 = arith.constant 0 : i32
    return %arg0, %arg1 : i32, i32
  }
  func.func @transform_2(%arg0: i32, %arg1: i32) -> (i32, i32) {
    %c0_i32 = arith.constant 0 : i32
    %c0_i32_0 = arith.constant 0 : i32
    %c0_i32_1 = arith.constant 0 : i32
    return %c0_i32, %c0_i32_0 : i32, i32
  }
  func.func @transform_3(%arg0: i32, %arg1: i32) -> (i32, i32) {
    %c0_i32 = arith.constant 0 : i32
    %c0_i32_0 = arith.constant 0 : i32
    return %c0_i32, %arg0 : i32, i32
  }
}

</mosaic_0001>

<bundles_post_ra>
// kernel: linear_regression.1
= control target key start
LH: loop header
LB: loop body
LE: loop exit
PB: predicated region body
PF: predicated region fallthrough
CT: control target
= control target key end

     0   :  { %9 = vsyncpa [#allocation5], 0  ;;  %s194_s0 = inlined_call_operand.<no memory space> [shape: f32[1], index: 0, kind: input, shape index: {}]   ;;  %s195_s1 = inlined_call_operand.hbm [shape: f32[16,96], index: 1, kind: input, shape index: {}]   ;;  %s196_s2 = inlined_call_operand.vmem [shape: f32[1,128], index: 2, kind: input, shape index: {}]   ;;  %s197_s3 = inlined_call_operand.hbm [shape: f32[1,16], index: 3, kind: output, shape index: {}]  }
   0x1   :  { %10 = vsyncpa [#allocation6], 0  ;;  %s158_s12 = smov [#allocation4]  }
   0x2   :  { %s18_s13 = sshll.u32 %s158_s12, 4  ;;  %s19_s13 = int_to_ptr.vmem [resolvable:$true] %s18_s13 }
   0x3   :  { %s122_s14 = scalar_lea.vmem %s19_s13, 256  ;;  %p127_p1 = scmp.lt.s32.totalorder %s19_s13, %s19_s13 }
   0x4   :  { %p123_p0 = scmp.ne.s32.totalorder %s19_s13, %s122_s14  ;;  %p128_p2 = scmp.lt.s32.totalorder %s122_s14, %s122_s14 }
   0x6   :  { %p129_p3 = por %p128_p2, %p127_p1 }
   0x8   :  { %p130_p4 = pnand %p129_p3, %p123_p0 }
   0xa   :  { %133 = shalt.err (!%p130_p4)
}
   0xb   :  { %s159_s15 = smov 128   ;;  %s160_s16 = smov 8  }
   0xc   :  { %24 = dma.hbm_to_vmem [thread:$0]  %s195_s1, 256, %s19_s13, [#allocation5], %s159_s15, %s159_s15, %s160_s16  }
   0xd   :  { %154 = dma.done.wait [#allocation5], 256  }
   0xe   :  { %155 = vsyncadd [#allocation5], 4294967040  ;;  %v43_v0 = vlaneseq  ;;  %v36_v4 = vld [vmem:[#allocation4] sm:$0xff]  ;;  %v37_v6 = vld [vmem:[#allocation4 + $0x8] sm:$0xff]  ;;  %v74_v13 = vstv %s194_s0  ;;  %s161_s22 = smov [#allocation7]   ;;  %vm88_vm1 = vcmask 130112  }
   0xf   :  { %v109_v5 = vld [vmem:[%s196_s2] ss:$0 sm:$0xff]  ;;  %s99_s23 = sshll.u32 %s161_s22, 4  ;;  %vm91_vm2 = vcmask 122880   ;;  %s100_s23 = int_to_ptr.vmem [resolvable:$true] %s99_s23 }
  0x10   :  { %v44_v1 = vand.u32 127, %v43_v0  ;;  %v80_v2 = vshrl.u32 %v43_v0, 7  ;;  %s134_s2 = scalar_lea.vmem %s100_s23, 16  ;;  %s138_s24 = scalar_lea.vmem %s100_s23, 32 }
  0x11   :  { %p135_p5 = scmp.ne.s32.totalorder %s100_s23, %s134_s2  ;;  %p139_p6 = scmp.lt.s32.totalorder %s100_s23, %s100_s23 }
  0x12   :  { %v81_v3 = vsub.s32 %v44_v1, %v80_v2  ;;  %vm47_vm0 = vcmp.lt.s32.totalorder %v44_v1, 96  ;;  %v83_v11 = vadd.s32 4294967288, %v44_v1  ;;  %p140_p7 = scmp.lt.s32.totalorder %s138_s24, %s134_s2 }
  0x13   :  { %v48_v7 = vsel %vm47_vm0, %v36_v4, 0.0  ;;  %v49_v8 = vsel %vm47_vm0, %v37_v6, 0.0 }
  0x14   :  { %v56_v9 = vmul.f32 %v109_v5, %v48_v7  ;;  %v57_v10 = vmul.f32 %v109_v5, %v49_v8  ;;  %v86_v12 = vsub.s32 %v83_v11, %v80_v2  ;;  %p141_p8 = por %p140_p7, %p139_p6 }
  0x16   :  { %69 = vadd.xlane.f32.xlu0 %v56_v9  ;;  %p142_p9 = pnand %p141_p8, %p135_p5 }
  0x1a   :  { %71 = vadd.xlane.f32.xlu0 %v57_v10 }
  0x9f   :  { %v70_v14 = vpop.xlane.xlu0 %69 }
  0xa0   :  { %v75_v15 = vadd.f32 %v74_v13, %v70_v14 }
  0xa2   :  { %v82_v18 = vrot.slane %v75_v15, %v81_v3 }
  0xa3   :  { %v72_v16 = vpop.xlane.xlu0 %71 }
  0xa4   :  { %v76_v17 = vadd.f32 %v74_v13, %v72_v16 }
  0xa6   :  { %v87_v19 = vrot.slane %v76_v17, %v86_v12 }
  0xa8   :  { %v89_v20 = vsel %vm88_vm1, %v87_v19, %v82_v18 }
  0xa9   :  { %92 = vst.msk [vmem:[#allocation7] sm:$0x1] %vm91_vm2, %v89_v20 }
  0xaa   :  { %145 = shalt.err (!%p142_p9)
}
  0xab   :  { %102 = dma.vmem_to_hbm [thread:$0]  %s100_s23, 16, %s197_s3, [#allocation6]  }
  0xac   :  { %156 = dma.done.wait [#allocation6], 16  }
  0xad   :  { %157 = vsyncadd [#allocation6], 4294967280 }
  0xae   :  { %106 = vsyncpa [#allocation5], 1 }
  0xaf   :  { %107 = vsyncpa [#allocation6], 1 }

</bundles_post_ra>
